<compile_context>
chip_gen: v7x
topology: tpu7x:2x2x1
jax: 0.10.0
libtpu: 0.0.40
codegen_flags: <defaults>
</compile_context>

<pallas_src>
import functools

import jax
import jax.numpy as jnp
from jax import lax
from jax.experimental import pallas as pl
from jax.experimental.pallas import tpu as pltpu

BN_EPS = 1e-5
_LANE = 128
_TARGET_IN_BYTES = 2 << 20      # aim for ~2 MiB of x per grid step
_STREAM_VMEM_BUDGET = 24 << 20  # double-buffered x + out streaming blocks
_RESIDENT_BUDGET = 24 << 20     # single-pass path: x + out resident in VMEM
_MAX_TILE_N = 256


def _vmem_limit_bytes():
    """~75% of physical VMEM (48 MiB on v7x, 96 MiB on v5e/v6e)."""
    try:
        cap = int(pltpu.get_tpu_info().vmem_capacity_bytes)
    except Exception:  # not on TPU / API unavailable -> assume smallest (v7x 64 MiB)
        cap = 64 << 20
    return max(32 << 20, (cap * 3) // 4)


def _pick_tiles(n, c_in, c_out, length):
    """Byte-budget driven (tile_n, tile_l); tile_l is always a multiple of 128."""
    l128 = ((length + _LANE - 1) // _LANE) * _LANE
    col_bytes = 8 * (c_in + c_out)             # 2 buffers * 4 B * (in + out channels)
    max_cols = max(_LANE, _STREAM_VMEM_BUDGET // col_bytes)
    target_cols = max(_LANE, _TARGET_IN_BYTES // (4 * c_in))
    want_cols = int(min(max_cols, target_cols))

    # Largest multiple-of-128 divisor of the 128-rounded length that fits the
    # budget: minimal lane padding, maximal lane-dense tile.
    max_l = min(l128, max(_LANE, (want_cols // _LANE) * _LANE))
    tile_l = _LANE
    for t in range(max_l, 0, -_LANE):
        if l128 % t == 0:
            tile_l = t
            break

    # Batch tile: minimize number of batch steps, then padding waste.
    max_n = int(min(n, _MAX_TILE_N, max(1, want_cols // tile_l)))
    best = None
    for d in range(1, max_n + 1):
        steps = -(-n // d)
        waste = steps * d - n
        key = (steps, waste, -d)
        if best is None or key < best[0]:
            best = (key, d)
    tile_n = best[1]
    return tile_n, tile_l


# --------------------------------------------------------------------------- #
# Kernels
# --------------------------------------------------------------------------- #
def _stats_kernel(x_ref, sumx_ref, gram_ref, *, unroll):
    """Accumulate per-channel sum(x) and Gram = sum(x x^T) for one
    (batch-block, L-block) tile.  Outputs are per-batch-block partials that
    stay VMEM-resident across the inner ("arbitrary") L axis."""
    c_in = x_ref.shape[1]

    @pl.when(pl.program_id(1) == 0)
    def _():
        sumx_ref[...] = jnp.zeros_like(sumx_ref)
        gram_ref[...] = jnp.zeros_like(gram_ref)

    def body(i, carry):
        s, g = carry
        xi = x_ref[i]                                          # (c_in, tile_l)
        s = s + jnp.sum(xi, axis=1, keepdims=True)
        g = g + lax.dot_general(xi, xi, (((1,), (1,)), ((), ())),
                                preferred_element_type=jnp.float32)
        return s, g

    init = (jnp.zeros((c_in, 1), jnp.float32),
            jnp.zeros((c_in, c_in), jnp.float32))
    s, g = lax.fori_loop(0, x_ref.shape[0], body, init, unroll=unroll)
    sumx_ref[...] += s
    gram_ref[...] += g


def _conv_bn_relu_kernel(x_ref, w_ref, shift_ref, o_ref, *, unroll):
    """out = relu((scale * W) @ x + shift) for one (batch-block, L-block) tile."""
    w = w_ref[...]            # (c_out, c_in), BN scale already folded in
    shift = shift_ref[...]    # (c_out, 1)

    def body(i, _):
        y = jnp.dot(w, x_ref[i], preferred_element_type=jnp.float32)
        o_ref[i] = jnp.maximum(y + shift, 0.0)
        return 0

    lax.fori_loop(0, x_ref.shape[0], body, 0, unroll=unroll)


def _fused_resident_kernel(x_ref, w_ref, gamma_ref, beta_ref, o_ref, *,
                           inv_nl, unroll):
    """Single-pass path: x is fully VMEM-resident, so batch statistics and the
    fused conv + BN + ReLU come from a single HBM read of x."""
    n, c_in, _ = x_ref.shape

    def stats_body(i, carry):
        s, g = carry
        xi = x_ref[i]                                          # (c_in, L)
        s = s + jnp.sum(xi, axis=1, keepdims=True)
        g = g + lax.dot_general(xi, xi, (((1,), (1,)), ((), ())),
                                preferred_element_type=jnp.float32)
        return s, g

    init = (jnp.zeros((c_in, 1), jnp.float32),
            jnp.zeros((c_in, c_in), jnp.float32))
    sum_x, gram = lax.fori_loop(0, n, stats_body, init, unroll=unroll)

    w = w_ref[...]                                             # (c_out, c_in)
    mean_y = jnp.dot(w, sum_x, preferred_element_type=jnp.float32) * inv_nl
    ey2 = jnp.sum(jnp.dot(w, gram, preferred_element_type=jnp.float32) * w,
                  axis=1, keepdims=True) * inv_nl
    var_y = jnp.maximum(ey2 - mean_y * mean_y, 0.0)            # biased, as BN uses
    scale = gamma_ref[...] * lax.rsqrt(var_y + BN_EPS)         # (c_out, 1)
    shift = beta_ref[...] - scale * mean_y
    w_fold = w * scale

    def out_body(i, _):
        y = jnp.dot(w_fold, x_ref[i], preferred_element_type=jnp.float32)
        o_ref[i] = jnp.maximum(y + shift, 0.0)
        return 0

    lax.fori_loop(0, n, out_body, 0, unroll=unroll)


# --------------------------------------------------------------------------- #
# Wrappers
# --------------------------------------------------------------------------- #
def _forward_single_pass(x, w, gamma, beta, vmem_limit):
    n, c_in, length = x.shape
    c_out = w.shape[0]
    kernel = functools.partial(_fused_resident_kernel,
                               inv_nl=1.0 / float(n * length),
                               unroll=n <= 8)
    return pl.pallas_call(
        kernel,
        out_shape=jax.ShapeDtypeStruct((n, c_out, length), jnp.float32),
        compiler_params=pltpu.CompilerParams(vmem_limit_bytes=vmem_limit),
    )(x, w, gamma.reshape(c_out, 1), beta.reshape(c_out, 1))


def _forward_two_phase(x, w, gamma, beta, tile_n, tile_l, vmem_limit):
    n, c_in, length = x.shape
    c_out = w.shape[0]

    n_pad = -(-n // tile_n) * tile_n
    l_pad = -(-length // tile_l) * tile_l
    if n_pad != n or l_pad != length:
        # Zero padding is exact: zeros add nothing to sum(x)/Gram (we divide by
        # the true N*L), and padded output rows/lanes are sliced off below.
        x = jnp.pad(x, ((0, n_pad - n), (0, 0), (0, l_pad - length)))

    nb = n_pad // tile_n
    grid = (nb, l_pad // tile_l)
    unroll = tile_n <= 8

    # Phase 1: per-batch-block partial (sum_x, Gram).  Batch axis "parallel"
    # (both TensorCores on v7x), L axis "arbitrary" (VMEM-resident accumulate).
    sum_parts, gram_parts = pl.pallas_call(
        functools.partial(_stats_kernel, unroll=unroll),
        out_shape=(jax.ShapeDtypeStruct((nb, c_in, 1), jnp.float32),
                   jax.ShapeDtypeStruct((nb, c_in, c_in), jnp.float32)),
        grid=grid,
        in_specs=[pl.BlockSpec((tile_n, c_in, tile_l), lambda i, j: (i, 0, j))],
        out_specs=(pl.BlockSpec((None, c_in, 1), lambda i, j: (i, 0, 0)),
                   pl.BlockSpec((None, c_in, c_in), lambda i, j: (i, 0, 0))),
        compiler_params=pltpu.CompilerParams(
            dimension_semantics=("parallel", "arbitrary"),
            vmem_limit_bytes=vmem_limit),
    )(x)

    # Tiny XLA epilogue: merge partials, derive exact batch mean/var of y = W x
    # and fold gamma/beta + BN scale into the weight (the conv bias is exactly
    # cancelled by the batch-mean subtraction, so it is never materialized).
    nl = float(n * length)
    sum_x = jnp.sum(sum_parts, axis=0)                               # (c_in, 1)
    gram = jnp.sum(gram_parts, axis=0)                               # (c_in, c_in)
    mean_y = (w @ sum_x) / nl                                        # (c_out, 1)
    ey2 = jnp.sum((w @ gram) * w, axis=1, keepdims=True) / nl        # diag(W G W^T)/NL
    var_y = jnp.maximum(ey2 - mean_y * mean_y, 0.0)                  # biased, as BN
    scale = gamma.reshape(c_out, 1) * lax.rsqrt(var_y + BN_EPS)
    shift = beta.reshape(c_out, 1) - scale * mean_y
    w_fold = (w * scale).astype(jnp.float32)

    # Phase 2: fully parallel fused matmul + shift + ReLU on lane-dense tiles.
    out = pl.pallas_call(
        functools.partial(_conv_bn_relu_kernel, unroll=unroll),
        out_shape=jax.ShapeDtypeStruct((n_pad, c_out, l_pad), jnp.float32),
        grid=grid,
        in_specs=[pl.BlockSpec((tile_n, c_in, tile_l), lambda i, j: (i, 0, j)),
                  pl.BlockSpec((c_out, c_in), lambda i, j: (0, 0)),
                  pl.BlockSpec((c_out, 1), lambda i, j: (0, 0))],
        out_specs=pl.BlockSpec((tile_n, c_out, tile_l), lambda i, j: (i, 0, j)),
        compiler_params=pltpu.CompilerParams(
            dimension_semantics=("parallel", "parallel"),
            vmem_limit_bytes=vmem_limit),
    )(x, w_fold, shift)

    if n_pad != n or l_pad != length:
        out = out[:n, :, :length]
    return out


def conv1d_forward(x, w, b, gamma, beta, *, tile_n=None, tile_l=None,
                   single_pass=None):
    """Conv1d(kernel_size=1, stride=1) -> BatchNorm1d (training-mode batch
    statistics) -> ReLU.   x: (N, C_in, L) f32 -> (N, C_out, L) f32.

    The conv bias `b` is mathematically cancelled by training-mode BN's
    per-channel mean subtraction (and leaves the variance unchanged), so the
    kernels never touch it.
    """
    del b  # exactly cancelled by training-mode BatchNorm
    # TODO(synk): eval-mode BN (running stats / momentum buffers), if_bn=False,
    # and kernel_size>1 / stride>1 paths are not implemented (module defaults
    # are k=1, s=1, BN on); those paths must reintroduce the bias.
    n, c_in, length = x.shape
    c_out = w.shape[0]
    vmem_limit = _vmem_limit_bytes()

    if single_pass is None:
        resident_bytes = 4 * n * length * (c_in + c_out)
        single_pass = resident_bytes <= min(_RESIDENT_BUDGET, vmem_limit // 2)

    if single_pass:
        return _forward_single_pass(x, w, gamma, beta, vmem_limit)

    auto_n, auto_l = _pick_tiles(n, c_in, c_out, length)
    tile_n = auto_n if tile_n is None else int(tile_n)
    tile_l = auto_l if tile_l is None else int(tile_l)
    if tile_l % _LANE:
        raise ValueError("tile_l must be a multiple of 128")
    return _forward_two_phase(x, w, gamma, beta, tile_n, tile_l, vmem_limit)


def _reference_forward(x, w, b, gamma, beta):
    """Plain-JAX reference of the PyTorch forward (conv1d k=1 -> BN train -> relu)."""
    y = jnp.einsum("oc,ncl->nol", w, x) + b[None, :, None]
    mean = y.mean(axis=(0, 2), keepdims=True)
    var = ((y - mean) ** 2).mean(axis=(0, 2), keepdims=True)
    y_hat = (y - mean) / jnp.sqrt(var + BN_EPS)
    out = gamma[None, :, None] * y_hat + beta[None, :, None]
    return jnp.maximum(out, 0.0)


if __name__ == "__main__":
    # Shapes consistent with the module: batch=2, in_channel=4, out_channel=8, length=16.
    N, C_IN, C_OUT, L = 2, 4, 8, 16

    key = jax.random.PRNGKey(0)
    (kx, kw, kb, kg, kbeta,
     kx2, kw2, kb2, kg2, kbeta2) = jax.random.split(key, 10)

    x = jax.random.normal(kx, (N, C_IN, L), dtype=jnp.float32)
    w = jax.random.normal(kw, (C_OUT, C_IN), dtype=jnp.float32) * 0.1
    b = jax.random.normal(kb, (C_OUT,), dtype=jnp.float32) * 0.1
    gamma = 1.0 + 0.1 * jax.random.normal(kg, (C_OUT,), dtype=jnp.float32)
    beta = 0.1 * jax.random.normal(kbeta, (C_OUT,), dtype=jnp.float32)

    out = jax.jit(conv1d_forward)(x, w, b, gamma, beta)  # single-pass VMEM-resident path
    jax.block_until_ready(out)
    ref = _reference_forward(x, w, b, gamma, beta)
    assert out.shape == (N, C_OUT, L)
    assert jnp.allclose(out, ref, atol=1e-4, rtol=1e-4), "single-pass mismatch"

    # Also exercise the streaming two-phase path (batch + lane padding,
    # multi-block accumulation, per-batch-block partial merge) on small,
    # awkward (non-divisible) shapes with forced small tiles.
    N2, C_IN2, C_OUT2, L2 = 3, 5, 7, 200
    x2 = jax.random.normal(kx2, (N2, C_IN2, L2), dtype=jnp.float32)
    w2 = jax.random.normal(kw2, (C_OUT2, C_IN2), dtype=jnp.float32) * 0.1
    b2 = jax.random.normal(kb2, (C_OUT2,), dtype=jnp.float32) * 0.1
    g2 = 1.0 + 0.1 * jax.random.normal(kg2, (C_OUT2,), dtype=jnp.float32)
    be2 = 0.1 * jax.random.normal(kbeta2, (C_OUT2,), dtype=jnp.float32)

    two_phase = jax.jit(functools.partial(conv1d_forward, single_pass=False,
                                          tile_n=2, tile_l=128))
    out2 = two_phase(x2, w2, b2, g2, be2)
    jax.block_until_ready(out2)
    ref2 = _reference_forward(x2, w2, b2, g2, be2)
    assert out2.shape == (N2, C_OUT2, L2)
    assert jnp.allclose(out2, ref2, atol=1e-4, rtol=1e-4), "two-phase mismatch"

    print("KERNEL_OK")
</pallas_src>

<mosaic_0001>
module attributes {stable_mosaic.version = 11 : i64} {
  func.func @_fused_resident_kernel(%arg0: memref<2x4x16xf32, #tpu.memory_space<vmem>>, %arg1: memref<8x4xf32, #tpu.memory_space<vmem>>, %arg2: memref<8x1xf32, #tpu.memory_space<vmem>>, %arg3: memref<8x1xf32, #tpu.memory_space<vmem>>, %arg4: memref<2x8x16xf32, #tpu.memory_space<vmem>>) attributes {dimension_semantics = [], scalar_prefetch = 0 : i64, scratch_operands = 0 : i64, tpu.core_type = #tpu.core_type<tc>} {
    %cst = arith.constant 0.000000e+00 : f32
    %0 = vector.broadcast %cst : f32 to vector<4x1xf32>
    %cst_0 = arith.constant 0.000000e+00 : f32
    %1 = vector.broadcast %cst_0 : f32 to vector<4x4xf32>
    %c0_i32 = arith.constant 0 : i32
    %2 = arith.index_cast %c0_i32 : i32 to index
    %c0 = arith.constant 0 : index
    %c0_1 = arith.constant 0 : index
    %3 = vector.load %arg0[%2, %c0, %c0_1] : memref<2x4x16xf32, #tpu.memory_space<vmem>>, vector<1x4x16xf32>
    %4 = vector.shape_cast %3 : vector<1x4x16xf32> to vector<4x16xf32>
    %cst_2 = arith.constant dense<0.000000e+00> : vector<4xf32>
    %5 = vector.multi_reduction <add>, %4, %cst_2 [1] : vector<4x16xf32> to vector<4xf32>
    %6 = vector.shape_cast %5 : vector<4xf32> to vector<4x1xf32>
    %7 = arith.addf %0, %6 : vector<4x1xf32>
    %cst_3 = arith.constant dense<0.000000e+00> : vector<4x4xf32>
    %8 = tpu.matmul %4, %4, %cst_3 {dimension_numbers = #tpu.dot_dimension_numbers<[1], [1], [0], [0], [0, 0, 1, 0], [], []>} : vector<4x16xf32>, vector<4x16xf32>, vector<4x4xf32> -> vector<4x4xf32>
    %9 = arith.addf %1, %8 : vector<4x4xf32>
    %c1_i32 = arith.constant 1 : i32
    %10 = arith.index_cast %c1_i32 : i32 to index
    %c0_4 = arith.constant 0 : index
    %c0_5 = arith.constant 0 : index
    %11 = vector.load %arg0[%10, %c0_4, %c0_5] : memref<2x4x16xf32, #tpu.memory_space<vmem>>, vector<1x4x16xf32>
    %12 = vector.shape_cast %11 : vector<1x4x16xf32> to vector<4x16xf32>
    %cst_6 = arith.constant dense<0.000000e+00> : vector<4xf32>
    %13 = vector.multi_reduction <add>, %12, %cst_6 [1] : vector<4x16xf32> to vector<4xf32>
    %14 = vector.shape_cast %13 : vector<4xf32> to vector<4x1xf32>
    %15 = arith.addf %7, %14 : vector<4x1xf32>
    %cst_7 = arith.constant dense<0.000000e+00> : vector<4x4xf32>
    %16 = tpu.matmul %12, %12, %cst_7 {dimension_numbers = #tpu.dot_dimension_numbers<[1], [1], [0], [0], [0, 0, 1, 0], [], []>} : vector<4x16xf32>, vector<4x16xf32>, vector<4x4xf32> -> vector<4x4xf32>
    %17 = arith.addf %9, %16 : vector<4x4xf32>
    %c2_i32 = arith.constant 2 : i32
    %c0_8 = arith.constant 0 : index
    %c0_9 = arith.constant 0 : index
    %18 = vector.load %arg1[%c0_8, %c0_9] : memref<8x4xf32, #tpu.memory_space<vmem>>, vector<8x4xf32>
    %cst_10 = arith.constant dense<0.000000e+00> : vector<8x1xf32>
    %19 = tpu.matmul %18, %15, %cst_10 {dimension_numbers = #tpu.dot_dimension_numbers<[1], [0], [0], [1], [0, 0, 1, 1], [], []>} : vector<8x4xf32>, vector<4x1xf32>, vector<8x1xf32> -> vector<8x1xf32>
    %cst_11 = arith.constant 3.125000e-02 : f32
    %20 = vector.broadcast %cst_11 : f32 to vector<8x1xf32>
    %21 = arith.mulf %19, %20 : vector<8x1xf32>
    %cst_12 = arith.constant dense<0.000000e+00> : vector<8x4xf32>
    %22 = tpu.matmul %18, %17, %cst_12 {dimension_numbers = #tpu.dot_dimension_numbers<[1], [0], [0], [1], [0, 0, 1, 1], [], []>} : vector<8x4xf32>, vector<4x4xf32>, vector<8x4xf32> -> vector<8x4xf32>
    %23 = arith.mulf %22, %18 : vector<8x4xf32>
    %cst_13 = arith.constant dense<0.000000e+00> : vector<8xf32>
    %24 = vector.multi_reduction <add>, %23, %cst_13 [1] : vector<8x4xf32> to vector<8xf32>
    %25 = vector.shape_cast %24 : vector<8xf32> to vector<8x1xf32>
    %cst_14 = arith.constant 3.125000e-02 : f32
    %26 = vector.broadcast %cst_14 : f32 to vector<8x1xf32>
    %27 = arith.mulf %25, %26 : vector<8x1xf32>
    %28 = arith.mulf %21, %21 : vector<8x1xf32>
    %29 = arith.subf %27, %28 : vector<8x1xf32>
    %cst_15 = arith.constant 0.000000e+00 : f32
    %30 = vector.broadcast %cst_15 : f32 to vector<8x1xf32>
    %31 = arith.maximumf %29, %30 : vector<8x1xf32>
    %c0_16 = arith.constant 0 : index
    %c0_17 = arith.constant 0 : index
    %32 = vector.load %arg2[%c0_16, %c0_17] : memref<8x1xf32, #tpu.memory_space<vmem>>, vector<8x1xf32>
    %cst_18 = arith.constant 9.99999974E-6 : f32
    %33 = vector.broadcast %cst_18 : f32 to vector<8x1xf32>
    %34 = arith.addf %31, %33 : vector<8x1xf32>
    %35 = math.rsqrt %34 : vector<8x1xf32>
    %36 = arith.mulf %32, %35 : vector<8x1xf32>
    %c0_19 = arith.constant 0 : index
    %c0_20 = arith.constant 0 : index
    %37 = vector.load %arg3[%c0_19, %c0_20] : memref<8x1xf32, #tpu.memory_space<vmem>>, vector<8x1xf32>
    %38 = arith.mulf %36, %21 : vector<8x1xf32>
    %39 = arith.subf %37, %38 : vector<8x1xf32>
    %40 = vector.broadcast %36 : vector<8x1xf32> to vector<8x4xf32>
    %41 = arith.mulf %18, %40 : vector<8x4xf32>
    %c0_i32_21 = arith.constant 0 : i32
    %42 = arith.index_cast %c0_i32_21 : i32 to index
    %c0_22 = arith.constant 0 : index
    %c0_23 = arith.constant 0 : index
    %43 = vector.load %arg0[%42, %c0_22, %c0_23] : memref<2x4x16xf32, #tpu.memory_space<vmem>>, vector<1x4x16xf32>
    %44 = vector.shape_cast %43 : vector<1x4x16xf32> to vector<4x16xf32>
    %cst_24 = arith.constant dense<0.000000e+00> : vector<8x16xf32>
    %45 = tpu.matmul %41, %44, %cst_24 {dimension_numbers = #tpu.dot_dimension_numbers<[1], [0], [0], [1], [0, 0, 1, 1], [], []>} : vector<8x4xf32>, vector<4x16xf32>, vector<8x16xf32> -> vector<8x16xf32>
    %46 = vector.broadcast %39 : vector<8x1xf32> to vector<8x16xf32>
    %47 = arith.addf %45, %46 : vector<8x16xf32>
    %cst_25 = arith.constant 0.000000e+00 : f32
    %48 = vector.broadcast %cst_25 : f32 to vector<8x16xf32>
    %49 = arith.maximumf %47, %48 : vector<8x16xf32>
    %50 = arith.index_cast %c0_i32_21 : i32 to index
    %c0_26 = arith.constant 0 : index
    %c0_27 = arith.constant 0 : index
    %51 = vector.load %arg4[%50, %c0_26, %c0_27] : memref<2x8x16xf32, #tpu.memory_space<vmem>>, vector<1x8x16xf32>
    %52 = vector.shape_cast %51 : vector<1x8x16xf32> to vector<8x16xf32>
    %53 = vector.shape_cast %49 : vector<8x16xf32> to vector<1x8x16xf32>
    tpu.vector_store %arg4[%50, %c0_26, %c0_27], %53 {strides = array<i32>} : memref<2x8x16xf32, #tpu.memory_space<vmem>>, vector<1x8x16xf32>,
    %c1_i32_28 = arith.constant 1 : i32
    %54 = arith.index_cast %c1_i32_28 : i32 to index
    %c0_29 = arith.constant 0 : index
    %c0_30 = arith.constant 0 : index
    %55 = vector.load %arg0[%54, %c0_29, %c0_30] : memref<2x4x16xf32, #tpu.memory_space<vmem>>, vector<1x4x16xf32>
    %56 = vector.shape_cast %55 : vector<1x4x16xf32> to vector<4x16xf32>
    %cst_31 = arith.constant dense<0.000000e+00> : vector<8x16xf32>
    %57 = tpu.matmul %41, %56, %cst_31 {dimension_numbers = #tpu.dot_dimension_numbers<[1], [0], [0], [1], [0, 0, 1, 1], [], []>} : vector<8x4xf32>, vector<4x16xf32>, vector<8x16xf32> -> vector<8x16xf32>
    %58 = vector.broadcast %39 : vector<8x1xf32> to vector<8x16xf32>
    %59 = arith.addf %57, %58 : vector<8x16xf32>
    %cst_32 = arith.constant 0.000000e+00 : f32
    %60 = vector.broadcast %cst_32 : f32 to vector<8x16xf32>
    %61 = arith.maximumf %59, %60 : vector<8x16xf32>
    %62 = arith.index_cast %c1_i32_28 : i32 to index
    %c0_33 = arith.constant 0 : index
    %c0_34 = arith.constant 0 : index
    %63 = vector.load %arg4[%62, %c0_33, %c0_34] : memref<2x8x16xf32, #tpu.memory_space<vmem>>, vector<1x8x16xf32>
    %64 = vector.shape_cast %63 : vector<1x8x16xf32> to vector<8x16xf32>
    %65 = vector.shape_cast %61 : vector<8x16xf32> to vector<1x8x16xf32>
    tpu.vector_store %arg4[%62, %c0_33, %c0_34], %65 {strides = array<i32>} : memref<2x8x16xf32, #tpu.memory_space<vmem>>, vector<1x8x16xf32>,
    %c2_i32_35 = arith.constant 2 : i32
    return
  }
}

</mosaic_0001>

<bundles_post_ra>
// kernel: conv1d_forward.1
= control target key start
LH: loop header
LB: loop body
LE: loop exit
PB: predicated region body
PF: predicated region fallthrough
CT: control target
= control target key end

     0   :  { %vm30_vm0 = vcmask 130048   ;;  %vm19_vm1 = vcmask 125952   ;;  %v618_v1 = vmov 0.0   ;;  %vm619_vm2 = vmmov 0   ;;  %s700_s0 = inlined_call_operand.vmem [shape: f32[2,4,16], index: 0, kind: input, shape index: {}]   ;;  %s701_s1 = inlined_call_operand.vmem [shape: f32[8,4], index: 1, kind: input, shape index: {}]   ;;  %s702_s2 = inlined_call_operand.vmem [shape: f32[8,1], index: 2, kind: input, shape index: {}]   ;;  %s703_s3 = inlined_call_operand.vmem [shape: f32[8,1], index: 3, kind: input, shape index: {}]   ;;  %s704_s4 = inlined_call_operand.hbm [shape: f32[2,8,16], index: 4, kind: output, shape index: {}]  }
   0x1   :  { %v526_v0 = vld [vmem:[%s700_s0 + $0x4] sm:$0xf]  ;;  %552 = vmatprep.subr.mxu0 %v618_v1  ;;  %554 = vmatprep.mubr.msk.f32.mxu0 %vm619_vm2, %v618_v1  ;;  %v18_v2 = vld [vmem:[%s700_s0] sm:$0xf] }
   0x2   :  { %9 = vsyncpa [#allocation3], 0  ;;  %553 = vmatpush3.xpose.msk.msra.mxu0 %vm30_vm0, %v526_v0  ;;  %v20_v3 = vsel %vm19_vm1, %v18_v2, 0.0  ;;  %562 = vmatprep.subr.mxu1 %v618_v1  ;;  %v26_v4 = vsel %vm19_vm1, %v526_v0, 0.0  ;;  %vm182_vm3 = vcmask 1043456   ;;  %v177_v8 = vld [vmem:[%s701_s1] sm:$0xff] }
   0x3   :  { %557 = vmatprep.subr.mxu0 %v618_v1  ;;  %21 = vadd.xlane.f32.xlu0 %v20_v3  ;;  %vm178_vm4 = vcmask 31744   ;;  %v620_v17 = vmov 0   ;;  %v338_v25 = vld [vmem:[%s702_s2] sm:$0xff]  ;;  %s621_s2 = smov [#allocation2]  }
   0x4   :  { %564 = vmatprep.mubr.msk.f32.mxu1 %vm619_vm2, %v618_v1  ;;  %590 = vset.pattern.permute.xlu1 %v620_v17  ;;  %v342_v28 = vld [vmem:[%s703_s3] sm:$0xff]  ;;  %s515_s26 = sshll.u32 %s621_s2, 4  ;;  %s516_s26 = int_to_ptr.vmem [resolvable:$true] %s515_s26 }
   0x5   :  { %555 = vmatmul.mubr.msk.f32.vlgmr.msra.gmra.mrb[0].mxu0 %vm30_vm0, %v526_v0  ;;  %591 = vset.pattern.permute.xlu0 %v620_v17  ;;  %v537_v30 = vld [vmem:[%s700_s0 + $0x4] sm:$0xf]  ;;  %s594_s0 = scalar_lea.vmem %s516_s26, 256  ;;  %p599_p1 = scmp.lt.s32.totalorder %s516_s26, %s516_s26 }
   0x6   :  { %558 = vmatpush3.xpose.msk.msra.mxu0 %vm30_vm0, %v18_v2  ;;  %559 = vmatprep.mubr.msk.f32.mxu0 %vm619_vm2, %v618_v1  ;;  %p595_p0 = scmp.ne.s32.totalorder %s516_s26, %s594_s0  ;;  %p600_p2 = scmp.lt.s32.totalorder %s594_s0, %s594_s0 }
   0x7   :  { %27 = vadd.xlane.f32.xlu0 %v26_v4  ;;  %577 = vmatprep.subr.mxu0 %v618_v1 }
   0x8   :  { %p601_p3 = por %p600_p2, %p599_p1 }
   0xa   :  { %p602_p4 = pnand %p601_p3, %p595_p0 }
   0xd   :  { %560 = vmatmul.mubr.msk.f32.vlgmr.msra.gmra.mrb[0].mxu0 %vm30_vm0, %v18_v2 }
   0xe   :  { %579 = vmatprep.mubr.msk.f32.mxu0 %vm619_vm2, %v618_v1  ;;  %578 = vmatpush3.msk.msra.mxu0 %vm182_vm3, %v537_v30 }
  0x90   :  { %v22_v5 = vpop.xlane.xlu0 %21 }
  0x94   :  { %v28_v6 = vpop.xlane.xlu0 %27 }
  0x95   :  { %v29_v7 = vadd.f32 %v28_v6, %v22_v5 }
  0x97   :  { %563 = vmatpush3.msk.msra.mxu1 %vm182_vm3, %v29_v7 }
  0x98   :  { %565 = vmatmul.mubr.msk.f32.vlgmr.msra.gmra.mrb[0].mxu1 %vm178_vm4, %v177_v8  ;;  %567 = vmatprep.subr.mxu1 %v618_v1 }
  0x99   :  { %569 = vmatprep.mubr.msk.f32.mxu1 %vm619_vm2, %v618_v1 }
  0xe0   :  { %v173_v9 = vpop.f32.mrb[0].mxu0 }
  0xe1   :  { %v561_v10 = vpop.f32.mrb[1].mxu0  ;;  %568 = vmatpush3.msk.msra.mxu1 %vm182_vm3, %v173_v9 }
  0xe2   :  { %570 = vmatmul.mubr.msk.f32.vlgmr.msra.gmra.mrb[2].mxu1 %vm178_vm4, %v177_v8  ;;  %572 = vmatprep.subr.mxu1 %v618_v1 }
  0xe3   :  { %573 = vmatpush3.msk.msra.mxu1 %vm182_vm3, %v18_v2  ;;  %574 = vmatprep.mubr.msk.f32.mxu1 %vm619_vm2, %v618_v1 }
 0x16b   :  { %v252_v11 = vpop.f32.mrb[0].mxu1 }
 0x16c   :  { %v566_v12 = vpop.f32.mrb[1].mxu1  ;;  %v256_v18 = vmul.f32 0.03125, %v252_v11 }
 0x16e   :  { %v335_v20 = vmul.f32 %v256_v18, %v256_v18 }
 0x1b5   :  { %v326_v13 = vpop.f32.mrb[2].mxu1 }
 0x1b6   :  { %v330_v14 = vmul.f32 %v326_v13, %v177_v8  ;;  %v571_v15 = vpop.f32.mrb[3].mxu1 }
 0x1b8   :  { %v331_v16 = vsel %vm178_vm4, %v330_v14, 0.0 }
 0x1b9   :  { %332 = vadd.xlane.f32.xlu1 %v331_v16 }
 0x246   :  { %v333_v19 = vpop.xlane.xlu1 %332 }
 0x247   :  { %v334_v21 = vmul.f32 0.03125, %v333_v19 }
 0x249   :  { %v336_v22 = vsub.f32 %v334_v21, %v335_v20 }
 0x24b   :  { %v337_v23 = vmax.f32 %v336_v22, 0.0 }
 0x24d   :  { %v339_v24 = vadd.f32 1e-05, %v337_v23 }
 0x24f   :  { %592 = vrsqrt.f32 %v339_v24 }
 0x259   :  { %v593_v26 = vpop.eup %592 }
 0x25a   :  { %v341_v27 = vmul.f32 %v593_v26, %v338_v25 }
 0x25c   :  { %347 = vperm.xlu1 %590, %v341_v27   ;;  %v343_v29 = vmul.f32 %v341_v27, %v256_v18 }
 0x25e   :  { %v344_v31 = vsub.f32 %v342_v28, %v343_v29 }
 0x260   :  { %353 = vperm.xlu0 %591, %v344_v31  }
 0x2db   :  { %v348_v32 = vpop.permute.xlu1 %347 }
 0x2dc   :  { %v350_v33 = vmul.f32 %v348_v32, %v177_v8 }
 0x2de   :  { %575 = vmatmul.mubr.msk.f32.vlgmr.msra.gmra.mrb[4].mxu1 %vm178_vm4, %v350_v33  ;;  %580 = vmatmul.mubr.msk.f32.vlgmr.msra.gmra.mrb[2].mxu0 %vm178_vm4, %v350_v33 }
 0x2df   :  { %v354_v34 = vpop.permute.xlu0 %353 }
 0x3b1   :  { %v427_v35 = vpop.f32.mrb[4].mxu1  ;;  %v503_v36 = vpop.f32.mrb[2].mxu0 }
 0x3b2   :  { %v428_v37 = vadd.f32 %v427_v35, %v354_v34  ;;  %v504_v38 = vadd.f32 %v503_v36, %v354_v34  ;;  %v576_v39 = vpop.f32.mrb[5].mxu1  ;;  %v581_v40 = vpop.f32.mrb[3].mxu0 }
 0x3b4   :  { %v431_v41 = vmax.f32 %v428_v37, 0.0  ;;  %v507_v42 = vmax.f32 %v504_v38, 0.0 }
 0x3b6   :  { %432 = vst.msk [vmem:[#allocation2] sm:$0xff] %vm30_vm0, %v431_v41  ;;  %509 = vst.msk [vmem:[#allocation2 + $0x8] sm:$0xff] %vm30_vm0, %v507_v42 }
 0x3b7   :  { %605 = shalt.err (!%p602_p4)
}
 0x3b8   :  { %s606_s28 = scalar_lea.hbm %s704_s4, 256 }
 0x3b9   :  { %p607_p5 = scmp.ne.s32.totalorder %s704_s4, %s606_s28  ;;  %p610_p6 = scmp.lt.u32.totalorder %s606_s28, %s704_s4 }
 0x3bb   :  { %p612_p7 = pnand %p610_p6, %p607_p5 }
 0x3bd   :  { %615 = shalt.err (!%p612_p7)
}
 0x3be   :  { %s622_s7 = smov 128   ;;  %s623_s8 = smov 8  }
 0x3bf   :  { %521 = dma.vmem_to_hbm [thread:$0]  %s516_s26, 256, %s704_s4, [#allocation3], %s622_s7, %s622_s7, %s623_s8  }
 0x3c0   :  { %616 = dma.done.wait [#allocation3], 256  }
 0x3c1   :  { %617 = vsyncadd [#allocation3], 4294967040 }
 0x3c2   :  { %525 = vsyncpa [#allocation3], 1 }

</bundles_post_ra>
